<compile_context>
chip_gen: v5e
topology: v5e:2x2
jax: 0.10.0
libtpu: 0.0.40
codegen_flags: <defaults>
</compile_context>

<pallas_src>
import jax
import jax.numpy as jnp
from jax.experimental import pallas as pl
from jax.experimental.pallas import tpu as pltpu

_LANE = 128
_TILE_TARGET_BYTES = 4 * 1024 * 1024     # ~86% of HBM roofline measured at 4 MiB tiles
_VMEM_LIMIT_BYTES = 32 * 1024 * 1024     # covers 4 x 4 MiB double-buffered footprint on all gens
_MIN_SPLIT_BYTES = 1 * 1024 * 1024       # only split across TCs if each part >= 1 MiB


def _copy_kernel(x_ref, o_ref):
    # Pure elementwise pass-through on the current VMEM tile.
    o_ref[...] = x_ref[...]


def _sublane_multiple(dtype) -> int:
    """Native sublane tile for dtype: 8 (f32), 16 (bf16), 32 (int8/fp8)."""
    return max(8, 32 // jnp.dtype(dtype).itemsize)


def _num_tensorcores() -> int:
    """Best-effort TC-per-chip query; defaults to 1 (no forced grid split)."""
    try:
        info = pltpu.get_tpu_info()
        for attr in ("num_cores", "tensorcores_per_chip", "num_tensorcores",
                     "cores_per_chip"):
            v = getattr(info, attr, None)
            if v:
                return int(v)
    except Exception:
        pass
    return 1


def _choose_lane_width(total: int) -> int:
    """Widest lane-dense C (multiple of 128) that divides `total` exactly."""
    for c in (1024, 512, 256, 128):
        if total % c == 0:
            return c
    return _LANE  # rare fallback; caller pads the tail to a multiple of 128


def pallas_identity(x: jax.Array, *, donate: bool = False) -> jax.Array:
    """Lane-dense, tiled identity copy through VMEM (Pallas demo data path)."""
    total = x.size
    if total == 0:
        return x  # degenerate shape: nothing to copy

    orig_shape = x.shape
    dtype = x.dtype
    itemsize = jnp.dtype(dtype).itemsize
    sub = _sublane_multiple(dtype)

    C = _choose_lane_width(total)
    pad = (-total) % C
    flat = x.reshape(-1)
    if pad:
        # TODO(synk): rare tail path (total not a multiple of 128); could be an
        # in-kernel masked store instead of this concat + final slice.
        flat = jnp.concatenate([flat, jnp.zeros((pad,), dtype=dtype)])
    rows = (total + pad) // C
    x2d = flat.reshape(rows, C)

    row_bytes = C * itemsize
    total_bytes = rows * row_bytes

    if total_bytes <= _TILE_TARGET_BYTES:
        # Small-input fast path: one grid step, full-array block.
        tile_r = rows
        n_tc = _num_tensorcores()
        if n_tc > 1 and total_bytes >= n_tc * _MIN_SPLIT_BYTES and rows >= n_tc * sub:
            # Only split for multiple TensorCores when each part is still >= 1 MiB.
            tile_r = ((pl.cdiv(rows, n_tc) + sub - 1) // sub) * sub
    else:
        # ~4 MiB tiles, rounded to the dtype's native sublane count; the ragged
        # final block is handled by Pallas via pl.cdiv (no row padding needed).
        tile_r = max(sub, ((_TILE_TARGET_BYTES // row_bytes) // sub) * sub)
        tile_r = min(tile_r, rows)

    grid = (pl.cdiv(rows, tile_r),)
    block = (tile_r, C)

    out2d = pl.pallas_call(
        _copy_kernel,
        out_shape=jax.ShapeDtypeStruct((rows, C), dtype),
        grid=grid,
        in_specs=[pl.BlockSpec(block, lambda i: (i, 0))],
        out_specs=pl.BlockSpec(block, lambda i: (i, 0)),
        input_output_aliases=({0: 0} if (donate and pad == 0) else {}),
        compiler_params=pltpu.CompilerParams(
            dimension_semantics=("parallel",),
            vmem_limit_bytes=_VMEM_LIMIT_BYTES,
        ),
    )(x2d)

    if pad:
        return out2d.reshape(-1)[:total].reshape(orig_shape)
    return out2d.reshape(orig_shape)


def dhead_forward(x: jax.Array):
    """Faithful reproduction of DHead.forward: ignores x, returns None.

    Per the performance review, no Pallas kernel is launched here — the module
    has no compute, so the biggest optimization is not launching anything.
    """
    output = None
    return output


if __name__ == "__main__":
    key = jax.random.PRNGKey(0)
    # Small NCHW input consistent with an MNIST-style discriminator head input.
    x = jax.random.normal(key, (2, 4, 16, 16), dtype=jnp.float32)

    # Demo 1: plain pass-through kernel (single grid step, no pad path).
    y = pallas_identity(x)
    jax.block_until_ready(y)
    assert y.shape == x.shape
    assert bool(jnp.array_equal(y, x)), "identity pass-through mismatch"

    # Demo 2: donated/aliased pass-through (input_output_aliases={0: 0}).
    donated_copy = jax.jit(lambda a: pallas_identity(a, donate=True),
                           donate_argnums=0)
    x2 = x + 1.0
    y2 = donated_copy(x2)
    jax.block_until_ready(y2)
    assert bool(jnp.array_equal(y2, x + 1.0)), "aliased pass-through mismatch"

    # Faithful module forward: returns None (matches PyTorch semantics), and
    # launches no kernel at all.
    output = dhead_forward(x)
    assert output is None

    print("KERNEL_OK")
</pallas_src>

<mosaic_0001>
module attributes {stable_mosaic.version = 11 : i64} {
  func.func @_copy_kernel(%arg0: i32, %arg1: memref<2x1024xf32, #tpu.memory_space<vmem>>, %arg2: memref<2x1024xf32, #tpu.memory_space<vmem>>) attributes {dimension_semantics = [#tpu.dimension_semantics<parallel>], iteration_bounds = array<i64: 1>, scalar_prefetch = 0 : i64, scratch_operands = 0 : i64, tpu.core_type = #tpu.core_type<tc>, window_params = [{transform_indices = @transform_0, window_bounds = array<i64: 2, 1024>}, {transform_indices = @transform_1, window_bounds = array<i64: 2, 1024>}]} {
    %c0 = arith.constant 0 : index
    %c0_0 = arith.constant 0 : index
    %0 = vector.load %arg1[%c0, %c0_0] : memref<2x1024xf32, #tpu.memory_space<vmem>>, vector<2x1024xf32>
    %c0_1 = arith.constant 0 : index
    %c0_2 = arith.constant 0 : index
    %1 = vector.load %arg2[%c0_1, %c0_2] : memref<2x1024xf32, #tpu.memory_space<vmem>>, vector<2x1024xf32>
    tpu.vector_store %arg2[%c0_1, %c0_2], %0 {strides = array<i32>} : memref<2x1024xf32, #tpu.memory_space<vmem>>, vector<2x1024xf32>,
    return
  }
  func.func @transform_0(%arg0: i32) -> (i32, i32) {
    %c0_i32 = arith.constant 0 : i32
    %c0_i32_0 = arith.constant 0 : i32
    return %arg0, %c0_i32 : i32, i32
  }
  func.func @transform_1(%arg0: i32) -> (i32, i32) {
    %c0_i32 = arith.constant 0 : i32
    %c0_i32_0 = arith.constant 0 : i32
    return %arg0, %c0_i32 : i32, i32
  }
}

</mosaic_0001>

<bundles_post_ra>
// kernel: tpu_custom_call.1
= control target key start
LH: loop header
LB: loop body
LE: loop exit
PB: predicated region body
PF: predicated region fallthrough
CT: control target
= control target key end

     0   :  { %6 = vsyncpa [#allocation3], 0  ;;  %s116_s0 = inlined_call_operand.hbm [shape: f32[2,1024], index: 0, kind: input, shape index: {}]   ;;  %s117_s1 = inlined_call_operand.hbm [shape: f32[2,1024], index: 1, kind: output, shape index: {}]  }
   0x1   :  { %7 = vsyncpa [#allocation4], 0  ;;  %s13_s8 = sshll.u32 %s116_s0, 4  ;;  %s98_s9 = smov [#allocation2]   ;;  %s14_s8 = int_to_ptr.hbm [resolvable:$true] %s13_s8 }
   0x2   :  { %s15_s10 = sshll.u32 %s98_s9, 4  ;;  %s16_s10 = int_to_ptr.vmem [resolvable:$true] %s15_s10 }
   0x3   :  { %18 = dma.hbm_to_vmem [thread:$0]  %s14_s8, 256, %s16_s10, [#allocation3]  }
   0x4   :  { %94 = dma.done.wait [#allocation3], 256  }
   0x5   :  { %95 = vsyncadd [#allocation3], 4294967040  ;;  %s99_s11 = smov [#allocation5]   ;;  %s34_s15 = sshll.u32 %s117_s1, 4  ;;  %v23_v0 = vld [vmem:[#allocation2] sm:$0xff]  ;;  %v24_v1 = vld [vmem:[#allocation2 + $0x8] sm:$0xff]  ;;  %s35_s15 = int_to_ptr.hbm [resolvable:$true] %s34_s15 }
   0x6   :  { %s32_s12 = sshll.u32 %s99_s11, 4  ;;  %25 = vst [vmem:[#allocation5] sm:$0xff] %v23_v0  ;;  %s33_s12 = int_to_ptr.vmem [resolvable:$true] %s32_s12 }
   0x7   :  { %26 = vst [vmem:[#allocation5 + $0x8] sm:$0xff] %v24_v1 }
   0x8   :  { %37 = dma.vmem_to_hbm [thread:$0]  %s33_s12, 256, %s35_s15, [#allocation4]  }
   0x9   :  { %96 = dma.done.wait [#allocation4], 256  }
   0xa   :  { %97 = vsyncadd [#allocation4], 4294967040 }
   0xb   :  { %42 = vsyncpa [#allocation3], 1 }
   0xc   :  { %43 = vsyncpa [#allocation4], 1 }

</bundles_post_ra>
